<compile_context>
chip_gen: v7x
topology: tpu7x:2x2x1
jax: 0.10.0
libtpu: 0.0.40
codegen_flags: <defaults>
</compile_context>

<pallas_src>
import functools

import jax
import jax.numpy as jnp
from jax import lax
from jax.experimental import pallas as pl
from jax.experimental.pallas import tpu as pltpu


# Below this C_in the 1x1 conv is an unrolled VPU broadcast-FMA (an MXU matmul
# with K=4..16 would waste almost all of its tiles); larger C_in uses the MXU.
# ~8-16 is the right ceiling for v5e (4 f32 VALU slots, no bf16 VPU).
_VPU_CHANNEL_LIMIT = 16

# Scoped-VMEM limit: safe on every generation (v7x has only 64 MiB physical).
_VMEM_LIMIT_BYTES = 48 * 1024 * 1024
# Budget for double-buffered I/O tiles + in-kernel (C_out, TS) f32 temporaries
# (keeps per-stream tiles in the measured 2-8 MiB sweet spot, << 75% of limit).
_TILE_BUDGET_BYTES = 12 * 1024 * 1024


def _cdiv(a, b):
    return -(-a // b)


def _round_up(a, b):
    return _cdiv(a, b) * b


def _block_spec(shape, index_map, buffers=2):
    """BlockSpec with optional >2-deep multi-buffering (best-effort)."""
    if buffers > 2:
        try:
            return pl.BlockSpec(shape, index_map,
                                pipeline_mode=pl.Buffered(buffers))
        except (TypeError, AttributeError):
            pass  # fall back to default double-buffering
    return pl.BlockSpec(shape, index_map)


def _channel_matmul(w, x):
    """(C_out, C_in) @ (C_in, TS) -> (C_out, TS) in f32.

    Tiny C_in: unrolled VPU broadcast multiply-accumulate (the big spatial dim
    stays on the lane axis). Larger C_in: MXU matmul.
    """
    c_out, c_in = w.shape
    if c_in <= _VPU_CHANNEL_LIMIT:
        acc = w[:, 0:1] * x[0:1, :]
        for k in range(1, c_in):
            acc = acc + w[:, k:k + 1] * x[k:k + 1, :]
        return acc
    return jnp.dot(w, x, preferred_element_type=jnp.float32)


# ---------------------------- kernels ---------------------------------------


def _x_stats_kernel(x_ref, stat_ref):
    # x_ref: (1, C_in, TS). stat_ref: (1, C_in, C_in+1) merged per-tile stats:
    #   columns [0, C_in) = Gram matrix S = x @ x^T, column C_in = sum_x.
    # No C_out-sized temporaries; the Gram contraction (K = TS) hits the MXU.
    x = x_ref[0].astype(jnp.float32)
    c_in = x.shape[0]
    gram = lax.dot_general(x, x, (((1,), (1,)), ((), ())),
                           preferred_element_type=jnp.float32)
    stat_ref[0, :, 0:c_in] = gram
    stat_ref[0, :, c_in:c_in + 1] = jnp.sum(x, axis=1, keepdims=True)


def _apply_recompute_kernel(x_ref, wf_ref, shift_ref, o_ref):
    # Recompute the cheap small-K conv; BN scale is pre-folded into wf.
    x = x_ref[0].astype(jnp.float32)
    y = _channel_matmul(wf_ref[...], x) + shift_ref[...]
    o_ref[0] = jnp.maximum(y, 0.1 * y).astype(o_ref.dtype)  # LeakyReLU(0.1)


def _conv_store_stats_kernel(x_ref, w_ref, y_ref, stat_ref):
    # Reduction convs (C_in > 2*C_out): compute y once, store it (f32) and
    # emit the merged per-tile stats (sum_y | sumsq_y) as a single output.
    x = x_ref[0].astype(jnp.float32)
    w = w_ref[...].astype(jnp.float32)
    y = _channel_matmul(w, x)
    y_ref[0] = y
    stat_ref[0, :, 0:1] = jnp.sum(y, axis=1, keepdims=True)
    stat_ref[0, :, 1:2] = jnp.sum(y * y, axis=1, keepdims=True)


def _apply_from_y_kernel(y_ref, scale_ref, shift_ref, o_ref):
    y = y_ref[0] * scale_ref[...] + shift_ref[...]
    o_ref[0] = jnp.maximum(y, 0.1 * y).astype(o_ref.dtype)  # LeakyReLU(0.1)


# ---------------------------- wrapper ----------------------------------------


def _pick_spatial_tile(n, hw, c_in, c_out):
    # f32 bytes resident per spatial column: double-buffered x and out/y tiles
    # plus ~2 (C_out, TS)-sized f32 compute temporaries inside the kernels.
    bytes_per_col = 4 * (2 * (c_in + c_out) + 2 * c_out)
    cap = max(128, (_TILE_BUDGET_BYTES // bytes_per_col) // 128 * 128)
    # Keep the grid at >= ~4 total steps so v7x's 2 TensorCores both get work
    # and the DMA pipeline has something to overlap with.
    want_s = max(1, _cdiv(4, n))
    ts_for_steps = _round_up(max(1, _cdiv(hw, want_s)), 128)
    return max(128, min(cap, ts_for_steps, _round_up(hw, 128)))


@functools.partial(jax.jit, static_argnames=("spatial_tile", "x_buffers"))
def pointwise_conv(x_nchw, weight, gamma, beta, *, eps=1e-5,
                   spatial_tile=None, x_buffers=2):
    """Forward of PointwiseConv (1x1 conv no-bias -> train-mode BatchNorm2d ->
    LeakyReLU(0.1)).

    x_nchw: (N, C_in, H, W); weight: (C_out, C_in) (squeezed 1x1 kernel);
    gamma, beta: (C_out,). Returns (N, C_out, H, W) in x_nchw.dtype.
    x_buffers: raise to 3 on v5e/v6e (128 MiB VMEM) when there are many
    spatial tiles to deepen the pipeline on the dominant x/y stream.
    """
    n, c_in, h, w_sp = x_nchw.shape
    c_out = weight.shape[0]
    hw = h * w_sp
    m_total = n * hw  # true (unpadded) BN sample count

    if spatial_tile is not None:
        ts = int(spatial_tile)
        if ts != hw and ts % 128 != 0:
            raise ValueError("spatial_tile must be a multiple of 128")
    else:
        ts = _pick_spatial_tile(n, hw, c_in, c_out)
    hw_pad = _round_up(hw, ts)
    num_s = hw_pad // ts

    # Pure reshape (no transpose); zero-pad H*W up to the tile grid if needed.
    # Padded columns give y = W@0 = 0, so they do not perturb the statistics
    # (we always divide by the true m_total).
    x = x_nchw.reshape(n, c_in, hw)
    if hw_pad != hw:
        x = jnp.pad(x, ((0, 0), (0, 0), (0, hw_pad - hw)))

    cparams = pltpu.CompilerParams(
        dimension_semantics=("parallel", "parallel"),
        vmem_limit_bytes=_VMEM_LIMIT_BYTES,
    )

    buffers = x_buffers if num_s >= x_buffers else 2
    x_spec = _block_spec((1, c_in, ts), lambda i, s: (i, 0, s), buffers)
    o_spec = pl.BlockSpec((1, c_out, ts), lambda i, s: (i, 0, s))
    w_spec = pl.BlockSpec((c_out, c_in), lambda i, s: (0, 0))
    vec_spec = pl.BlockSpec((c_out, 1), lambda i, s: (0, 0))
    out_shape = jax.ShapeDtypeStruct((n, c_out, hw_pad), x_nchw.dtype)

    w32 = weight.astype(jnp.float32)
    gamma32 = gamma.astype(jnp.float32)
    beta32 = beta.astype(jnp.float32)

    store_y = c_in > 2 * c_out  # HBM-traffic-optimal pass structure

    if not store_y:
        # ---- Pass 1: x-only stats (Gram S | sum_x), one merged output ------
        stat_spec = pl.BlockSpec((1, c_in, c_in + 1),
                                 lambda i, s: (i * num_s + s, 0, 0))
        stats = pl.pallas_call(
            _x_stats_kernel,
            grid=(n, num_s),
            in_specs=[x_spec],
            out_specs=stat_spec,
            out_shape=jax.ShapeDtypeStruct((n * num_s, c_in, c_in + 1),
                                           jnp.float32),
            compiler_params=cparams,
        )(x)

        # Tiny XLA finalisation: global train-mode (biased) batch stats.
        gram = jnp.sum(stats[:, :, :c_in], axis=0)        # (C_in, C_in)
        sum_x = jnp.sum(stats[:, :, c_in], axis=0)        # (C_in,)
        mean = (w32 @ sum_x) / m_total                    # (C_out,)
        ey2 = jnp.sum((w32 @ gram) * w32, axis=1) / m_total
        # TODO(synk): E[y^2]-mean^2 can cancel when |mean| >> std; a dedicated
        # centered pass would be needed for extreme activation offsets.
        var = jnp.maximum(ey2 - mean * mean, 0.0)
        scale_vec = gamma32 * lax.rsqrt(var + eps)
        shift = (beta32 - mean * scale_vec).reshape(c_out, 1)
        w_folded = w32 * scale_vec[:, None]               # fold BN scale into W

        # ---- Pass 2: recompute small-K conv, add shift, LeakyReLU ----------
        out = pl.pallas_call(
            _apply_recompute_kernel,
            grid=(n, num_s),
            in_specs=[x_spec, w_spec, vec_spec],
            out_specs=o_spec,
            out_shape=out_shape,
            compiler_params=cparams,
        )(x, w_folded, shift)
    else:
        # ---- Pass 1: compute & store unnormalized y + merged y-stats -------
        stat_spec = pl.BlockSpec((1, c_out, 2),
                                 lambda i, s: (i * num_s + s, 0, 0))
        y_store, stats = pl.pallas_call(
            _conv_store_stats_kernel,
            grid=(n, num_s),
            in_specs=[x_spec, w_spec],
            out_specs=(o_spec, stat_spec),
            out_shape=(jax.ShapeDtypeStruct((n, c_out, hw_pad), jnp.float32),
                       jax.ShapeDtypeStruct((n * num_s, c_out, 2),
                                            jnp.float32)),
            compiler_params=cparams,
        )(x, weight)

        sum_y = jnp.sum(stats[:, :, 0], axis=0)
        sumsq_y = jnp.sum(stats[:, :, 1], axis=0)
        mean = sum_y / m_total
        var = jnp.maximum(sumsq_y / m_total - mean * mean, 0.0)
        scale = (gamma32 * lax.rsqrt(var + eps)).reshape(c_out, 1)
        shift = beta32.reshape(c_out, 1) - mean.reshape(c_out, 1) * scale

        # ---- Pass 2: read stored y, scale/shift + LeakyReLU only -----------
        y_spec = _block_spec((1, c_out, ts), lambda i, s: (i, 0, s), buffers)
        out = pl.pallas_call(
            _apply_from_y_kernel,
            grid=(n, num_s),
            in_specs=[y_spec, vec_spec, vec_spec],
            out_specs=o_spec,
            out_shape=out_shape,
            compiler_params=cparams,
        )(y_store, scale, shift)

    if hw_pad != hw:
        out = out[:, :, :hw]
    return out.reshape(n, c_out, h, w_sp)


# ---------------------------- reference & test --------------------------------


def _reference(x_nchw, weight, gamma, beta, eps=1e-5):
    # Pure-JAX reference with identical semantics (train-mode BatchNorm2d).
    n, c_in, h, w = x_nchw.shape
    c_out = weight.shape[0]
    x_mat = jnp.transpose(x_nchw, (0, 2, 3, 1)).reshape(-1, c_in).astype(jnp.float32)
    y = x_mat @ weight.T.astype(jnp.float32)
    mean = jnp.mean(y, axis=0, keepdims=True)
    var = jnp.mean((y - mean) ** 2, axis=0, keepdims=True)
    y_hat = (y - mean) / jnp.sqrt(var + eps) * gamma[None, :].astype(jnp.float32) \
            + beta[None, :].astype(jnp.float32)
    out = jnp.where(y_hat >= 0, y_hat, 0.1 * y_hat)
    return jnp.transpose(out.reshape(n, h, w, c_out), (0, 3, 1, 2))


if __name__ == "__main__":
    key = jax.random.PRNGKey(0)
    k_x, k_w, k_g, k_b, k_x2, k_x3, k_w2 = jax.random.split(key, 7)

    # --- Case 1: expansion conv (C_in < C_out) -> recompute path, auto tiling.
    N, C_IN, C_OUT, H, W = 2, 4, 8, 16, 16
    x = jax.random.normal(k_x, (N, C_IN, H, W), dtype=jnp.float32)
    # nn.Conv2d(in, out, 1, bias=False).weight is (out, in, 1, 1); keep it squeezed.
    weight = jax.random.normal(k_w, (C_OUT, C_IN), dtype=jnp.float32) * 0.1
    gamma = 1.0 + 0.1 * jax.random.normal(k_g, (C_OUT,), dtype=jnp.float32)
    beta = 0.1 * jax.random.normal(k_b, (C_OUT,), dtype=jnp.float32)
    ref = _reference(x, weight, gamma, beta)

    out = jax.block_until_ready(pointwise_conv(x, weight, gamma, beta))
    assert out.shape == (N, C_OUT, H, W) and out.dtype == x.dtype
    assert jnp.allclose(out, ref, atol=1e-4, rtol=1e-4), "mismatch (auto tiling)"

    # --- Case 2: single full-extent spatial tile (grid (N, 1)).
    out_full = jax.block_until_ready(
        pointwise_conv(x, weight, gamma, beta, spatial_tile=256))
    assert jnp.allclose(out_full, ref, atol=1e-4, rtol=1e-4), "mismatch (full tile)"

    # --- Case 3: bf16 activations -> bf16 output (dtype follows input).
    x_bf = x.astype(jnp.bfloat16)
    out_bf = jax.block_until_ready(pointwise_conv(x_bf, weight, gamma, beta))
    assert out_bf.dtype == jnp.bfloat16
    ref_bf = _reference(x_bf, weight, gamma, beta)
    assert jnp.allclose(out_bf.astype(jnp.float32), ref_bf, atol=3e-2, rtol=3e-2), \
        "mismatch (bf16)"

    # --- Case 4: non-128-aligned spatial size -> zero-padded tiling path.
    x_pad = jax.random.normal(k_x2, (1, C_IN, 12, 12), dtype=jnp.float32)
    ref_pad = _reference(x_pad, weight, gamma, beta)
    out_pad = jax.block_until_ready(pointwise_conv(x_pad, weight, gamma, beta))
    assert out_pad.shape == (1, C_OUT, 12, 12)
    assert jnp.allclose(out_pad, ref_pad, atol=1e-4, rtol=1e-4), "mismatch (padded)"

    # --- Case 5: channel-reduction conv (C_in > 2*C_out) -> store-y path.
    C_IN2, C_OUT2 = 16, 4
    x_r = jax.random.normal(k_x3, (2, C_IN2, H, W), dtype=jnp.float32)
    w_r = jax.random.normal(k_w2, (C_OUT2, C_IN2), dtype=jnp.float32) * 0.1
    gamma_r, beta_r = gamma[:C_OUT2], beta[:C_OUT2]
    ref_r = _reference(x_r, w_r, gamma_r, beta_r)
    out_r = jax.block_until_ready(pointwise_conv(x_r, w_r, gamma_r, beta_r))
    assert jnp.allclose(out_r, ref_r, atol=1e-4, rtol=1e-4), "mismatch (store-y)"

    print("KERNEL_OK")
</pallas_src>

<mosaic_0001>
module attributes {stable_mosaic.version = 11 : i64} {
  func.func @_x_stats_kernel(%arg0: i32, %arg1: i32, %arg2: memref<1x4x128xf32, #tpu.memory_space<vmem>>, %arg3: memref<1x4x5xf32, #tpu.memory_space<vmem>>) attributes {dimension_semantics = [#tpu.dimension_semantics<parallel>, #tpu.dimension_semantics<parallel>], iteration_bounds = array<i64: 2, 2>, scalar_prefetch = 0 : i64, scratch_operands = 0 : i64, tpu.core_type = #tpu.core_type<tc>, window_params = [{transform_indices = @transform_0, window_bounds = array<i64: 1, 4, 128>}, {transform_indices = @transform_1, window_bounds = array<i64: 1, 4, 5>}]} {
    %c0 = arith.constant 0 : index
    %c0_0 = arith.constant 0 : index
    %c0_1 = arith.constant 0 : index
    %0 = vector.load %arg2[%c0, %c0_0, %c0_1] : memref<1x4x128xf32, #tpu.memory_space<vmem>>, vector<1x4x128xf32>
    %1 = vector.shape_cast %0 : vector<1x4x128xf32> to vector<4x128xf32>
    %cst = arith.constant dense<0.000000e+00> : vector<4x4xf32>
    %2 = tpu.matmul %1, %1, %cst {dimension_numbers = #tpu.dot_dimension_numbers<[1], [1], [0], [0], [0, 0, 1, 0], [], []>} : vector<4x128xf32>, vector<4x128xf32>, vector<4x4xf32> -> vector<4x4xf32>
    %c0_2 = arith.constant 0 : index
    %c0_3 = arith.constant 0 : index
    %c0_4 = arith.constant 0 : index
    %3 = vector.load %arg3[%c0_2, %c0_3, %c0_4] : memref<1x4x5xf32, #tpu.memory_space<vmem>>, vector<1x4x4xf32>
    %4 = vector.shape_cast %3 : vector<1x4x4xf32> to vector<4x4xf32>
    %5 = vector.shape_cast %2 : vector<4x4xf32> to vector<1x4x4xf32>
    tpu.vector_store %arg3[%c0_2, %c0_3, %c0_4], %5 {strides = array<i32>} : memref<1x4x5xf32, #tpu.memory_space<vmem>>, vector<1x4x4xf32>,
    %cst_5 = arith.constant dense<0.000000e+00> : vector<4xf32>
    %6 = vector.multi_reduction <add>, %1, %cst_5 [1] : vector<4x128xf32> to vector<4xf32>
    %7 = vector.shape_cast %6 : vector<4xf32> to vector<4x1xf32>
    %c0_6 = arith.constant 0 : index
    %c0_7 = arith.constant 0 : index
    %c4 = arith.constant 4 : index
    %8 = vector.load %arg3[%c0_6, %c0_7, %c4] : memref<1x4x5xf32, #tpu.memory_space<vmem>>, vector<1x4x1xf32>
    %9 = vector.shape_cast %8 : vector<1x4x1xf32> to vector<4x1xf32>
    %10 = vector.shape_cast %7 : vector<4x1xf32> to vector<1x4x1xf32>
    tpu.vector_store %arg3[%c0_6, %c0_7, %c4], %10 {strides = array<i32>} : memref<1x4x5xf32, #tpu.memory_space<vmem>>, vector<1x4x1xf32>,
    return
  }
  func.func @transform_0(%arg0: i32, %arg1: i32) -> (i32, i32, i32) {
    %c0_i32 = arith.constant 0 : i32
    %c0_i32_0 = arith.constant 0 : i32
    return %arg0, %c0_i32, %arg1 : i32, i32, i32
  }
  func.func @transform_1(%arg0: i32, %arg1: i32) -> (i32, i32, i32) {
    %c2_i32 = arith.constant 2 : i32
    %0 = arith.muli %arg0, %c2_i32 : i32
    %1 = arith.addi %0, %arg1 : i32
    %c0_i32 = arith.constant 0 : i32
    %c0_i32_0 = arith.constant 0 : i32
    %c0_i32_1 = arith.constant 0 : i32
    return %1, %c0_i32, %c0_i32_0 : i32, i32, i32
  }
}

module attributes {stable_mosaic.version = 11 : i64} {
  func.func @_apply_recompute_kernel(%arg0: i32, %arg1: i32, %arg2: memref<1x4x128xf32, #tpu.memory_space<vmem>>, %arg3: memref<8x4xf32, #tpu.memory_space<vmem>>, %arg4: memref<8x1xf32, #tpu.memory_space<vmem>>, %arg5: memref<1x8x128xf32, #tpu.memory_space<vmem>>) attributes {dimension_semantics = [#tpu.dimension_semantics<parallel>, #tpu.dimension_semantics<parallel>], iteration_bounds = array<i64: 2, 2>, scalar_prefetch = 0 : i64, scratch_operands = 0 : i64, tpu.core_type = #tpu.core_type<tc>, window_params = [{transform_indices = @transform_0, window_bounds = array<i64: 1, 4, 128>}, {pipeline_mode = #tpu.pipeline_mode<synchronous>, transform_indices = @transform_1, window_bounds = array<i64: 8, 4>}, {pipeline_mode = #tpu.pipeline_mode<synchronous>, transform_indices = @transform_2, window_bounds = array<i64: 8, 1>}, {transform_indices = @transform_3, window_bounds = array<i64: 1, 8, 128>}]} {
    %c0 = arith.constant 0 : index
    %c0_0 = arith.constant 0 : index
    %c0_1 = arith.constant 0 : index
    %0 = vector.load %arg2[%c0, %c0_0, %c0_1] : memref<1x4x128xf32, #tpu.memory_space<vmem>>, vector<1x4x128xf32>
    %1 = vector.shape_cast %0 : vector<1x4x128xf32> to vector<4x128xf32>
    %c0_2 = arith.constant 0 : index
    %c0_3 = arith.constant 0 : index
    %2 = vector.load %arg3[%c0_2, %c0_3] : memref<8x4xf32, #tpu.memory_space<vmem>>, vector<8x4xf32>
    %3 = vector.extract_strided_slice %2 {offsets = [0, 0], sizes = [8, 1], strides = [1, 1]} : vector<8x4xf32> to vector<8x1xf32>
    %4 = vector.extract_strided_slice %1 {offsets = [0, 0], sizes = [1, 128], strides = [1, 1]} : vector<4x128xf32> to vector<1x128xf32>
    %5 = vector.broadcast %3 : vector<8x1xf32> to vector<8x128xf32>
    %6 = vector.broadcast %4 : vector<1x128xf32> to vector<8x128xf32>
    %7 = arith.mulf %5, %6 : vector<8x128xf32>
    %8 = vector.extract_strided_slice %2 {offsets = [0, 1], sizes = [8, 1], strides = [1, 1]} : vector<8x4xf32> to vector<8x1xf32>
    %9 = vector.extract_strided_slice %1 {offsets = [1, 0], sizes = [1, 128], strides = [1, 1]} : vector<4x128xf32> to vector<1x128xf32>
    %10 = vector.broadcast %8 : vector<8x1xf32> to vector<8x128xf32>
    %11 = vector.broadcast %9 : vector<1x128xf32> to vector<8x128xf32>
    %12 = arith.mulf %10, %11 : vector<8x128xf32>
    %13 = arith.addf %7, %12 : vector<8x128xf32>
    %14 = vector.extract_strided_slice %2 {offsets = [0, 2], sizes = [8, 1], strides = [1, 1]} : vector<8x4xf32> to vector<8x1xf32>
    %15 = vector.extract_strided_slice %1 {offsets = [2, 0], sizes = [1, 128], strides = [1, 1]} : vector<4x128xf32> to vector<1x128xf32>
    %16 = vector.broadcast %14 : vector<8x1xf32> to vector<8x128xf32>
    %17 = vector.broadcast %15 : vector<1x128xf32> to vector<8x128xf32>
    %18 = arith.mulf %16, %17 : vector<8x128xf32>
    %19 = arith.addf %13, %18 : vector<8x128xf32>
    %20 = vector.extract_strided_slice %2 {offsets = [0, 3], sizes = [8, 1], strides = [1, 1]} : vector<8x4xf32> to vector<8x1xf32>
    %21 = vector.extract_strided_slice %1 {offsets = [3, 0], sizes = [1, 128], strides = [1, 1]} : vector<4x128xf32> to vector<1x128xf32>
    %22 = vector.broadcast %20 : vector<8x1xf32> to vector<8x128xf32>
    %23 = vector.broadcast %21 : vector<1x128xf32> to vector<8x128xf32>
    %24 = arith.mulf %22, %23 : vector<8x128xf32>
    %25 = arith.addf %19, %24 : vector<8x128xf32>
    %c0_4 = arith.constant 0 : index
    %c0_5 = arith.constant 0 : index
    %26 = vector.load %arg4[%c0_4, %c0_5] : memref<8x1xf32, #tpu.memory_space<vmem>>, vector<8x1xf32>
    %27 = vector.broadcast %26 : vector<8x1xf32> to vector<8x128xf32>
    %28 = arith.addf %25, %27 : vector<8x128xf32>
    %cst = arith.constant 1.000000e-01 : f32
    %29 = vector.broadcast %cst : f32 to vector<8x128xf32>
    %30 = arith.mulf %29, %28 : vector<8x128xf32>
    %31 = arith.maximumf %28, %30 : vector<8x128xf32>
    %c0_6 = arith.constant 0 : index
    %c0_7 = arith.constant 0 : index
    %c0_8 = arith.constant 0 : index
    %32 = vector.load %arg5[%c0_6, %c0_7, %c0_8] : memref<1x8x128xf32, #tpu.memory_space<vmem>>, vector<1x8x128xf32>
    %33 = vector.shape_cast %32 : vector<1x8x128xf32> to vector<8x128xf32>
    %34 = vector.shape_cast %31 : vector<8x128xf32> to vector<1x8x128xf32>
    tpu.vector_store %arg5[%c0_6, %c0_7, %c0_8], %34 {strides = array<i32>} : memref<1x8x128xf32, #tpu.memory_space<vmem>>, vector<1x8x128xf32>,
    return
  }
  func.func @transform_0(%arg0: i32, %arg1: i32) -> (i32, i32, i32) {
    %c0_i32 = arith.constant 0 : i32
    %c0_i32_0 = arith.constant 0 : i32
    return %arg0, %c0_i32, %arg1 : i32, i32, i32
  }
  func.func @transform_1(%arg0: i32, %arg1: i32) -> (i32, i32) {
    %c0_i32 = arith.constant 0 : i32
    %c0_i32_0 = arith.constant 0 : i32
    %c0_i32_1 = arith.constant 0 : i32
    return %c0_i32, %c0_i32_0 : i32, i32
  }
  func.func @transform_2(%arg0: i32, %arg1: i32) -> (i32, i32) {
    %c0_i32 = arith.constant 0 : i32
    %c0_i32_0 = arith.constant 0 : i32
    %c0_i32_1 = arith.constant 0 : i32
    return %c0_i32, %c0_i32_0 : i32, i32
  }
  func.func @transform_3(%arg0: i32, %arg1: i32) -> (i32, i32, i32) {
    %c0_i32 = arith.constant 0 : i32
    %c0_i32_0 = arith.constant 0 : i32
    return %arg0, %c0_i32, %arg1 : i32, i32, i32
  }
}

</mosaic_0001>

<bundles_post_ra>
// kernel: pointwise_conv.2
= control target key start
LH: loop header
LB: loop body
LE: loop exit
PB: predicated region body
PF: predicated region fallthrough
CT: control target
= control target key end

     0   :  { %s418_s6 = smov 0   ;;  %s420_s7 = smov 0   ;;  %s479_s0 = inlined_call_operand.vmem [shape: f32[2,4,256], index: 0, kind: input, shape index: {}]   ;;  %s480_s1 = inlined_call_operand.vmem [shape: f32[4,4,5], index: 1, kind: output, shape index: {}]  }
   0x1   :  { %s422_s8 = smov 0   ;;  %s424_s9 = smov 0  }
   0x2   :  { %s426_s10 = smov 0  }
   0x3 LB: > { %s20_s11 = sadd.s32 1, %s396_s8  ;;  %s23_s12 = sadd.s32 1, %s400_s9  ;;  %s404_s10 = sphi %s426_s10, %s11_s10   ;;  %s400_s9 = sphi %s424_s9, %s484_s9   ;;  %s396_s8 = sphi %s422_s8, %s483_s8   ;;  %s392_s7 = sphi %s420_s7, %s482_s7   ;;  %s388_s6 = sphi %s418_s6, %s481_s6  }
   0x4   : > { %p21_p0 = scmp.ge.s32.totalorder %s20_s11, 2  ;;  %p310_p1 = scmp.ge.s32.totalorder %s404_s10, 1 }
   0x5   : > { %p108_p2 = scmp.lt.s32.totalorder %s404_s10, 5 }
   0x6   : > { %s486_s11 = smov (%p21_p0, %s20_s11), 0  ;;  %s488_s12 = smov (!%p21_p0, %s23_s12), %s400_s9 }
   0x7   : > { %p109_p3 = pnand %p310_p1, %p108_p2  ;;  %p25_p4 = scmp.ge.s32.totalorder %s488_s12, 2 }
   0x8   : > { %p132_p5 = scmp.lt.s32.totalorder (!%p109_p3), %s392_s7, 1  ;;  %p134_p6 = scmp.lt.s32.totalorder (!%p109_p3), %s388_s6, 1  ;;  %v406_v0 = vmov (!%p109_p3), 0.0   ;;  %vm407_vm0 = vmmov (!%p109_p3), 0   ;;  %vm221_vm1 = vcmask (!%p109_p3), 1043456   ;;  %vm219_vm2 = vcmask (!%p109_p3), 27648  }
   0x9   : > { %s490_s12 = smov (%p25_p4, %s488_s12), 0  ;;  %112 = sbr.rel (%p109_p3) target bundleno = 240 (0xf0), region = 24 }
   0xa   : > { %319 = vmatprep.subr.mxu0 (!%p109_p3), %v406_v0  ;;  %321 = vmatprep.mubr.msk.f32.mxu0 (!%p109_p3), %vm407_vm0, %v406_v0  ;;  %s313_s21 = sshll.u32 (!%p109_p3), %s392_s7, 1  ;;  %vm225_vm3 = vcmask (!%p109_p3), 35872  }
   0xb   : > { %s141_s22 = sadd.s32 (!%p109_p3), %s388_s6, %s313_s21 }
   0xc   : > { %p142_p7 = scmp.lt.s32.totalorder (!%p109_p3), %s141_s22, 3 }
  0x10   : > { %s133_s13 = scalar_select %p132_p5, %s392_s7, 1 }
  0x11   : > { %s135_s14 = scalar_select %p134_p6, %s388_s6, 1 }
  0x12   : > { %s311_s15 = sshll.u32 %s133_s13, 1  ;;  %s492_s22 = smov (!%p142_p7, %s141_s22), 3 }
  0x13   : > { %s137_s16 = sadd.s32 %s311_s15, %s135_s14  ;;  %s314_s23 = sshll.u32 %s492_s22, 2 }
  0x14   : > { %s312_s17 = sshll.u32 %s137_s16, 2  ;;  %s145_s26 = scalar_lea.vmem %s480_s1, %s314_s23 }
  0x15   : > { %s139_s20 = scalar_lea.vmem %s479_s0, %s312_s17 }
  0x16   : > { %v148_v1 = vld [vmem:[%s139_s20] sm:$0xf] }
  0x17   : > { %320 = vmatpush3.xpose.msra.mxu0 %v148_v1  ;;  %v222_v2 = vsel %vm221_vm1, %v148_v1, 0.0 }
  0x18   : > { %223 = vadd.xlane.f32.xlu0 %v222_v2 }
  0x1a   : > { %322 = vmatmul.mubr.f32.vlgmr.msra.gmra.mrb[0].mxu0 %v148_v1 }
  0xa5   : > { %v224_v3 = vpop.xlane.xlu0 %223 }
  0xed   : > { %v215_v4 = vpop.f32.mrb[0].mxu0 }
  0xee   : > { %220 = vst.msk [vmem:[%s145_s26] sm:$0xf] %vm219_vm2, %v215_v4  ;;  %v323_v5 = vpop.f32.mrb[1].mxu0 }
  0xef   : > { %226 = vst.msk [vmem:[%s145_s26] sm:$0xf] %vm225_vm3, %v224_v3 }
  0xf0 PF: > { %s11_s10 = sadd.s32 1, %s404_s10   ;;  %s481_s6 = smov %s396_s8 }
  0xf1   : > { %p8_p8 = scmp.ge.s32.totalorder %s11_s10, 6   ;;  %s482_s7 = smov %s400_s9 }
  0xf2   : > { %s483_s8 = smov %s486_s11  ;;  %s484_s9 = smov %s490_s12 }
  0xf3   :  { %10 = sbr.rel (!%p8_p8) target bundleno = 3 (0x3), region = 54 }

// kernel: pointwise_conv.3
= control target key start
LH: loop header
LB: loop body
LE: loop exit
PB: predicated region body
PF: predicated region fallthrough
CT: control target
= control target key end

     0   :  { %s465_s12 = smov 0   ;;  %s467_s13 = smov 0   ;;  %s534_s0 = inlined_call_operand.vmem [shape: f32[2,4,256], index: 0, kind: input, shape index: {}]   ;;  %s535_s1 = inlined_call_operand.vmem [shape: f32[8,4], index: 1, kind: input, shape index: {}]   ;;  %s536_s2 = inlined_call_operand.vmem [shape: f32[8,1], index: 2, kind: input, shape index: {}]   ;;  %s537_s3 = inlined_call_operand.vmem [shape: f32[2,8,256], index: 3, kind: output, shape index: {}]  }
   0x1   :  { %s469_s14 = smov 0   ;;  %s471_s15 = smov 0  }
   0x2   :  { %s473_s16 = smov 0  }
   0x3 LB: > { %s22_s17 = sadd.s32 1, %s431_s14  ;;  %s25_s18 = sadd.s32 1, %s435_s15  ;;  %s439_s16 = sphi %s473_s16, %s13_s16   ;;  %s435_s15 = sphi %s471_s15, %s541_s15   ;;  %s431_s14 = sphi %s469_s14, %s540_s14   ;;  %s427_s13 = sphi %s467_s13, %s539_s13   ;;  %s423_s12 = sphi %s465_s12, %s538_s12  }
   0x4   : > { %p23_p0 = scmp.ge.s32.totalorder %s22_s17, 2  ;;  %p344_p1 = scmp.ge.s32.totalorder %s439_s16, 1 }
   0x5   : > { %p156_p2 = scmp.lt.s32.totalorder %s439_s16, 5 }
   0x6   : > { %s543_s17 = smov (%p23_p0, %s22_s17), 0  ;;  %s545_s18 = smov (!%p23_p0, %s25_s18), %s435_s15 }
   0x7   : > { %p157_p3 = pnand %p344_p1, %p156_p2  ;;  %p27_p4 = scmp.ge.s32.totalorder %s545_s18, 2 }
   0x8   : > { %v203_v0 = vld [vmem:[%s535_s1] sm:$0xff] (!%p157_p3)  ;;  %v441_v1 = vmov (!%p157_p3), 0   ;;  %v442_v2 = vmov (!%p157_p3), 2   ;;  %v443_v3 = vmov (!%p157_p3), 1   ;;  %v444_v4 = vmov (!%p157_p3), 3   ;;  %p186_p5 = scmp.lt.s32.totalorder (!%p157_p3), %s427_s13, 1 }
   0x9   : > { %s547_s18 = smov (%p27_p4, %s545_s18), 0  ;;  %160 = sbr.rel (%p157_p3) target bundleno = 159 (0x9f), region = 32 }
   0xa   : > { %395 = vset.pattern.permute.xlu0 (!%p157_p3), %v441_v1  ;;  %397 = vset.pattern.permute.xlu1 (!%p157_p3), %v442_v2  ;;  %v244_v5 = vld [vmem:[%s536_s2] sm:$0xff] (!%p157_p3)  ;;  %p188_p6 = scmp.lt.s32.totalorder (!%p157_p3), %s423_s12, 1  ;;  %v209_v6 = vlaneseq (!%p157_p3) }
   0xb   : > { %206 = vperm.xlu0 (!%p157_p3), %395, %v203_v0   ;;  %225 = vperm.xlu1 (!%p157_p3), %397, %v203_v0  }
   0xc   : > { %v210_v7 = vshrl.u32 (!%p157_p3), %v209_v6, 7 }
   0xe   : > { %v211_v8 = vsub.s32 (!%p157_p3), 0, %v210_v7  ;;  %v220_v9 = vsub.s32 (!%p157_p3), 1, %v210_v7  ;;  %v230_v12 = vsub.s32 (!%p157_p3), 2, %v210_v7  ;;  %v240_v14 = vsub.s32 (!%p157_p3), 3, %v210_v7 }
   0xf   : > { %396 = vset.pattern.permute.xlu0 (!%p157_p3), %v443_v3  ;;  %398 = vset.pattern.permute.xlu1 (!%p157_p3), %v444_v4 }
  0x10   : > { %215 = vperm.xlu0 %396, %v203_v0   ;;  %235 = vperm.xlu1 %398, %v203_v0   ;;  %s549_s13 = smov (!%p186_p5, %s427_s13), 1  ;;  %s551_s12 = smov (!%p188_p6, %s423_s12), 1 }
  0x11   : > { %s345_s23 = sshll.u32 %s549_s13, 1 }
  0x12   : > { %s509_s24 = sadd.s32 %s345_s23, %s551_s12 }
  0x13   : > { %s346_s25 = sshll.u32 %s509_s24, 2  ;;  %s348_s29 = sshll.u32 %s509_s24, 3 }
  0x14   : > { %399 = vset.pattern.permute.xlu1 %v441_v1  ;;  %400 = vset.pattern.permute.xlu0 %v441_v1  ;;  %s193_s28 = scalar_lea.vmem %s534_s0, %s346_s25  ;;  %s201_s5 = scalar_lea.vmem %s537_s3, %s348_s29 }
  0x15   : > { %247 = vperm.xlu1 %399, %v244_v5   ;;  %v202_v10 = vld [vmem:[%s193_s28] sm:$0xf] }
  0x16   : > { %v212_v15 = vrot.slane %v202_v10, %v211_v8  ;;  %v221_v16 = vrot.slane %v202_v10, %v220_v9  ;;  %v231_v17 = vrot.slane %v202_v10, %v230_v12  ;;  %v241_v18 = vrot.slane %v202_v10, %v240_v14 }
  0x8a   : > { %v207_v11 = vpop.permute.xlu0 %206  ;;  %v226_v13 = vpop.permute.xlu1 %225 }
  0x8b   : > { %v213_v21 = vmul.f32 %v212_v15, %v207_v11  ;;  %v232_v23 = vmul.f32 %v231_v17, %v226_v13 }
  0x8f   : > { %v216_v19 = vpop.permute.xlu0 %215  ;;  %v236_v20 = vpop.permute.xlu1 %235 }
  0x90   : > { %v222_v22 = vmul.f32 %v221_v16, %v216_v19  ;;  %v242_v25 = vmul.f32 %v241_v18, %v236_v20 }
  0x92   : > { %v223_v24 = vadd.f32 %v222_v22, %v213_v21 }
  0x94   : > { %v233_v26 = vadd.f32 %v232_v23, %v223_v24  ;;  %v248_v27 = vpop.permute.xlu1 %247 }
  0x96   : > { %v243_v28 = vadd.f32 %v242_v25, %v233_v26 }
  0x98   : > { %v250_v29 = vadd.f32 %v248_v27, %v243_v28 }
  0x9a   : > { %v251_v30 = vmul.f32 0.1, %v250_v29 }
  0x9c   : > { %v252_v31 = vmax.f32 %v250_v29, %v251_v30 }
  0x9e   : > { %253 = vst [vmem:[%s201_s5] sm:$0xff] %v252_v31 }
  0x9f PF: > { %s13_s16 = sadd.s32 1, %s439_s16   ;;  %s538_s12 = smov %s431_s14 }
  0xa0   : > { %p10_p7 = scmp.ge.s32.totalorder %s13_s16, 6   ;;  %s539_s13 = smov %s435_s15 }
  0xa1   : > { %s540_s14 = smov %s543_s17  ;;  %s541_s15 = smov %s547_s18 }
  0xa2   :  { %12 = sbr.rel (!%p10_p7) target bundleno = 3 (0x3), region = 62 }

</bundles_post_ra>
